<compile_context>
chip_gen: v7x
topology: tpu7x:2x2x1
jax: 0.10.0
libtpu: 0.0.40
codegen_flags: <defaults>
</compile_context>

<pallas_src>
import functools
import math

import jax
import jax.numpy as jnp
from jax import lax
from jax.experimental import pallas as pl
from jax.experimental.pallas import tpu as pltpu


# ----------------------------------------------------------------------------
# Fused kernel: one (batch) slice per grid step.
# ----------------------------------------------------------------------------
def _fused_mha_ln_kernel(
    q_ref, k_ref, v_ref,                # (1, L, E), (1, S, E), (1, S, E)
    wq_ref, wk_ref, wv_ref,             # (E, E) each (already transposed)
    bq_ref, bk_ref, bv_ref,             # (1, E) each
    wo_ref, bo_ref,                     # (E, E), (1, E)
    g_ref, beta_ref,                    # (1, E), (1, E)
    out_ref, attn_ref,                  # (1, L, E), (1, L, S)
    *, heads, scale, eps,
):
    x_q = q_ref[0]                      # (L, E) — also the residual input
    x_k = k_ref[0]                      # (S, E)
    x_v = v_ref[0]                      # (S, E)

    # Input projections (f32 accumulate on the MXU).
    q = jnp.dot(x_q, wq_ref[...], preferred_element_type=jnp.float32) + bq_ref[...]
    k = jnp.dot(x_k, wk_ref[...], preferred_element_type=jnp.float32) + bk_ref[...]
    v = jnp.dot(x_v, wv_ref[...], preferred_element_type=jnp.float32) + bv_ref[...]

    L, E = q.shape
    S = k.shape[0]
    Dh = E // heads

    # Fold the softmax scale into Q once (cheaper than scaling every score tile).
    q = q * jnp.float32(scale)

    wo = wo_ref[...]                    # (E, E)

    o_acc = jnp.zeros((L, E), jnp.float32)      # out-proj accumulator
    probs_sum = jnp.zeros((L, S), jnp.float32)  # for head-averaged weights

    # Static per-head loop (unrolled); head h <-> embedding slice [h*Dh:(h+1)*Dh],
    # which matches nn.MultiheadAttention's bh = n*H + h view ordering.
    for h in range(heads):
        sl = slice(h * Dh, (h + 1) * Dh)
        q_h = q[:, sl]                  # (L, Dh)
        k_h = k[:, sl]                  # (S, Dh)
        v_h = v[:, sl]                  # (S, Dh)

        # Q @ K^T without materializing a transposed K tile.
        s = lax.dot_general(
            q_h, k_h, (((1,), (1,)), ((), ())),
            preferred_element_type=jnp.float32)          # (L, S)

        # Numerically stable softmax with reciprocal-multiply.
        m = jnp.max(s, axis=-1, keepdims=True)
        e = jnp.exp(s - m)
        denom = jnp.sum(e, axis=-1, keepdims=True)
        probs = e * pl.reciprocal(denom, approx=False)   # (L, S)
        probs_sum = probs_sum + probs

        ctx_h = jnp.dot(probs, v_h, preferred_element_type=jnp.float32)  # (L, Dh)
        # Fused output projection: ctx @ Wo == sum_h ctx_h @ Wo[h*Dh:(h+1)*Dh, :]
        o_acc = o_acc + jnp.dot(ctx_h, wo[sl, :], preferred_element_type=jnp.float32)

    attn_out = o_acc + bo_ref[...]                       # (L, E)

    # Residual + LayerNorm (biased variance, matches torch.nn.LayerNorm).
    y = attn_out + x_q
    mean = jnp.mean(y, axis=-1, keepdims=True)
    var = jnp.mean((y - mean) ** 2, axis=-1, keepdims=True)
    normed = (y - mean) * lax.rsqrt(var + eps)
    out_ref[0] = (normed * g_ref[...] + beta_ref[...]).astype(out_ref.dtype)

    # Head-averaged attention weights (average_attn_weights=True default).
    attn_ref[0] = (probs_sum * jnp.float32(1.0 / heads)).astype(attn_ref.dtype)


# ----------------------------------------------------------------------------
# Wrapper
# ----------------------------------------------------------------------------
def init_params(key, embed_size):
    E = embed_size
    k1, k2 = jax.random.split(key, 2)
    return {
        "in_proj_weight": 0.1 * jax.random.normal(k1, (3 * E, E), jnp.float32),
        "in_proj_bias": jnp.zeros((3 * E,), jnp.float32),
        "out_proj_weight": 0.1 * jax.random.normal(k2, (E, E), jnp.float32),
        "out_proj_bias": jnp.zeros((E,), jnp.float32),
        "ln_gamma": jnp.ones((E,), jnp.float32),
        "ln_beta": jnp.zeros((E,), jnp.float32),
    }


def self_attention_forward(params, value, key, query, heads, eps=1e-5):
    """forward(value, key, query) -> (LayerNorm(attn(query,key,value)+query), attn_weights).

    query: (L, N, E); key/value: (S, N, E).  mask=None path of the module.
    """
    # TODO(synk): attn_mask support (module default mask=None path implemented).
    L, N, E = query.shape
    S = key.shape[0]
    Dh = E // heads
    scale = 1.0 / math.sqrt(Dh)

    Wq_t = params["in_proj_weight"][:E].T           # (E, E)
    Wk_t = params["in_proj_weight"][E:2 * E].T
    Wv_t = params["in_proj_weight"][2 * E:].T
    bq = params["in_proj_bias"][:E].reshape(1, E)
    bk = params["in_proj_bias"][E:2 * E].reshape(1, E)
    bv = params["in_proj_bias"][2 * E:].reshape(1, E)
    Wo_t = params["out_proj_weight"].T              # (E, E)
    bo = params["out_proj_bias"].reshape(1, E)
    gamma = params["ln_gamma"].reshape(1, E)
    beta = params["ln_beta"].reshape(1, E)

    # Batch-major activations so every block's last two dims are full-extent.
    q_b = jnp.transpose(query, (1, 0, 2))           # (N, L, E)
    k_b = jnp.transpose(key, (1, 0, 2))             # (N, S, E)
    v_b = jnp.transpose(value, (1, 0, 2))           # (N, S, E)

    kernel = functools.partial(
        _fused_mha_ln_kernel, heads=heads, scale=scale, eps=eps)

    def rep2d(shape):
        # Grid-invariant (broadcast) block: weights/biases stay resident in VMEM.
        return pl.BlockSpec(shape, lambda b: (0, 0))

    out_b, attn_w = pl.pallas_call(
        kernel,
        out_shape=(
            jax.ShapeDtypeStruct((N, L, E), jnp.float32),
            jax.ShapeDtypeStruct((N, L, S), jnp.float32),
        ),
        grid=(N,),
        in_specs=[
            pl.BlockSpec((1, L, E), lambda b: (b, 0, 0)),   # query
            pl.BlockSpec((1, S, E), lambda b: (b, 0, 0)),   # key
            pl.BlockSpec((1, S, E), lambda b: (b, 0, 0)),   # value
            rep2d((E, E)), rep2d((E, E)), rep2d((E, E)),    # Wq, Wk, Wv (transposed)
            rep2d((1, E)), rep2d((1, E)), rep2d((1, E)),    # bq, bk, bv
            rep2d((E, E)), rep2d((1, E)),                   # Wo (transposed), bo
            rep2d((1, E)), rep2d((1, E)),                   # gamma, beta
        ],
        out_specs=(
            pl.BlockSpec((1, L, E), lambda b: (b, 0, 0)),
            pl.BlockSpec((1, L, S), lambda b: (b, 0, 0)),
        ),
        compiler_params=pltpu.CompilerParams(
            dimension_semantics=("parallel",)),
    )(q_b, k_b, v_b, Wq_t, Wk_t, Wv_t, bq, bk, bv, Wo_t, bo, gamma, beta)

    out = jnp.transpose(out_b, (1, 0, 2))           # back to (L, N, E)
    return out, attn_w


# ----------------------------------------------------------------------------
# Demo / smoke test
# ----------------------------------------------------------------------------
if __name__ == "__main__":
    EMBED = 32
    HEADS = 4
    L = 8       # target seq len
    S = 8       # source seq len
    BATCH = 2

    root = jax.random.PRNGKey(0)
    k_v, k_k, k_q, k_p = jax.random.split(root, 4)

    value = jax.random.normal(k_v, (S, BATCH, EMBED), jnp.float32)
    key_ = jax.random.normal(k_k, (S, BATCH, EMBED), jnp.float32)
    query = jax.random.normal(k_q, (L, BATCH, EMBED), jnp.float32)

    params = init_params(k_p, EMBED)

    out, attn_w = self_attention_forward(params, value, key_, query, HEADS)
    jax.block_until_ready((out, attn_w))

    assert out.shape == (L, BATCH, EMBED)
    assert attn_w.shape == (BATCH, L, S)
    assert bool(jnp.all(jnp.isfinite(out)))
    # Head-averaged softmax rows must sum to ~1.
    assert bool(jnp.allclose(attn_w.sum(axis=-1), 1.0, atol=1e-3))
    print("KERNEL_OK")
</pallas_src>

<mosaic_0001>
module attributes {stable_mosaic.version = 11 : i64} {
  func.func @_fused_mha_ln_kernel(%arg0: i32, %arg1: memref<1x8x32xf32, #tpu.memory_space<vmem>>, %arg2: memref<1x8x32xf32, #tpu.memory_space<vmem>>, %arg3: memref<1x8x32xf32, #tpu.memory_space<vmem>>, %arg4: memref<32x32xf32, #tpu.memory_space<vmem>>, %arg5: memref<32x32xf32, #tpu.memory_space<vmem>>, %arg6: memref<32x32xf32, #tpu.memory_space<vmem>>, %arg7: memref<1x32xf32, #tpu.memory_space<vmem>>, %arg8: memref<1x32xf32, #tpu.memory_space<vmem>>, %arg9: memref<1x32xf32, #tpu.memory_space<vmem>>, %arg10: memref<32x32xf32, #tpu.memory_space<vmem>>, %arg11: memref<1x32xf32, #tpu.memory_space<vmem>>, %arg12: memref<1x32xf32, #tpu.memory_space<vmem>>, %arg13: memref<1x32xf32, #tpu.memory_space<vmem>>, %arg14: memref<1x8x32xf32, #tpu.memory_space<vmem>>, %arg15: memref<1x8x8xf32, #tpu.memory_space<vmem>>) attributes {dimension_semantics = [#tpu.dimension_semantics<parallel>], iteration_bounds = array<i64: 2>, scalar_prefetch = 0 : i64, scratch_operands = 0 : i64, tpu.core_type = #tpu.core_type<tc>, window_params = [{transform_indices = @transform_0, window_bounds = array<i64: 1, 8, 32>}, {transform_indices = @transform_1, window_bounds = array<i64: 1, 8, 32>}, {transform_indices = @transform_2, window_bounds = array<i64: 1, 8, 32>}, {pipeline_mode = #tpu.pipeline_mode<synchronous>, transform_indices = @transform_3, window_bounds = array<i64: 32, 32>}, {pipeline_mode = #tpu.pipeline_mode<synchronous>, transform_indices = @transform_4, window_bounds = array<i64: 32, 32>}, {pipeline_mode = #tpu.pipeline_mode<synchronous>, transform_indices = @transform_5, window_bounds = array<i64: 32, 32>}, {pipeline_mode = #tpu.pipeline_mode<synchronous>, transform_indices = @transform_6, window_bounds = array<i64: 1, 32>}, {pipeline_mode = #tpu.pipeline_mode<synchronous>, transform_indices = @transform_7, window_bounds = array<i64: 1, 32>}, {pipeline_mode = #tpu.pipeline_mode<synchronous>, transform_indices = @transform_8, window_bounds = array<i64: 1, 32>}, {pipeline_mode = #tpu.pipeline_mode<synchronous>, transform_indices = @transform_9, window_bounds = array<i64: 32, 32>}, {pipeline_mode = #tpu.pipeline_mode<synchronous>, transform_indices = @transform_10, window_bounds = array<i64: 1, 32>}, {pipeline_mode = #tpu.pipeline_mode<synchronous>, transform_indices = @transform_11, window_bounds = array<i64: 1, 32>}, {pipeline_mode = #tpu.pipeline_mode<synchronous>, transform_indices = @transform_12, window_bounds = array<i64: 1, 32>}, {transform_indices = @transform_13, window_bounds = array<i64: 1, 8, 32>}, {transform_indices = @transform_14, window_bounds = array<i64: 1, 8, 8>}]} {
    %c0 = arith.constant 0 : index
    %c0_0 = arith.constant 0 : index
    %c0_1 = arith.constant 0 : index
    %0 = vector.load %arg1[%c0, %c0_0, %c0_1] : memref<1x8x32xf32, #tpu.memory_space<vmem>>, vector<1x8x32xf32>
    %1 = vector.shape_cast %0 : vector<1x8x32xf32> to vector<8x32xf32>
    %c0_2 = arith.constant 0 : index
    %c0_3 = arith.constant 0 : index
    %c0_4 = arith.constant 0 : index
    %2 = vector.load %arg2[%c0_2, %c0_3, %c0_4] : memref<1x8x32xf32, #tpu.memory_space<vmem>>, vector<1x8x32xf32>
    %3 = vector.shape_cast %2 : vector<1x8x32xf32> to vector<8x32xf32>
    %c0_5 = arith.constant 0 : index
    %c0_6 = arith.constant 0 : index
    %c0_7 = arith.constant 0 : index
    %4 = vector.load %arg3[%c0_5, %c0_6, %c0_7] : memref<1x8x32xf32, #tpu.memory_space<vmem>>, vector<1x8x32xf32>
    %5 = vector.shape_cast %4 : vector<1x8x32xf32> to vector<8x32xf32>
    %c0_8 = arith.constant 0 : index
    %c0_9 = arith.constant 0 : index
    %6 = vector.load %arg4[%c0_8, %c0_9] : memref<32x32xf32, #tpu.memory_space<vmem>>, vector<32x32xf32>
    %cst = arith.constant dense<0.000000e+00> : vector<8x32xf32>
    %7 = tpu.matmul %1, %6, %cst {dimension_numbers = #tpu.dot_dimension_numbers<[1], [0], [0], [1], [0, 0, 1, 1], [], []>} : vector<8x32xf32>, vector<32x32xf32>, vector<8x32xf32> -> vector<8x32xf32>
    %c0_10 = arith.constant 0 : index
    %c0_11 = arith.constant 0 : index
    %8 = vector.load %arg7[%c0_10, %c0_11] : memref<1x32xf32, #tpu.memory_space<vmem>>, vector<1x32xf32>
    %9 = vector.broadcast %8 : vector<1x32xf32> to vector<8x32xf32>
    %10 = arith.addf %7, %9 : vector<8x32xf32>
    %c0_12 = arith.constant 0 : index
    %c0_13 = arith.constant 0 : index
    %11 = vector.load %arg5[%c0_12, %c0_13] : memref<32x32xf32, #tpu.memory_space<vmem>>, vector<32x32xf32>
    %cst_14 = arith.constant dense<0.000000e+00> : vector<8x32xf32>
    %12 = tpu.matmul %3, %11, %cst_14 {dimension_numbers = #tpu.dot_dimension_numbers<[1], [0], [0], [1], [0, 0, 1, 1], [], []>} : vector<8x32xf32>, vector<32x32xf32>, vector<8x32xf32> -> vector<8x32xf32>
    %c0_15 = arith.constant 0 : index
    %c0_16 = arith.constant 0 : index
    %13 = vector.load %arg8[%c0_15, %c0_16] : memref<1x32xf32, #tpu.memory_space<vmem>>, vector<1x32xf32>
    %14 = vector.broadcast %13 : vector<1x32xf32> to vector<8x32xf32>
    %15 = arith.addf %12, %14 : vector<8x32xf32>
    %c0_17 = arith.constant 0 : index
    %c0_18 = arith.constant 0 : index
    %16 = vector.load %arg6[%c0_17, %c0_18] : memref<32x32xf32, #tpu.memory_space<vmem>>, vector<32x32xf32>
    %cst_19 = arith.constant dense<0.000000e+00> : vector<8x32xf32>
    %17 = tpu.matmul %5, %16, %cst_19 {dimension_numbers = #tpu.dot_dimension_numbers<[1], [0], [0], [1], [0, 0, 1, 1], [], []>} : vector<8x32xf32>, vector<32x32xf32>, vector<8x32xf32> -> vector<8x32xf32>
    %c0_20 = arith.constant 0 : index
    %c0_21 = arith.constant 0 : index
    %18 = vector.load %arg9[%c0_20, %c0_21] : memref<1x32xf32, #tpu.memory_space<vmem>>, vector<1x32xf32>
    %19 = vector.broadcast %18 : vector<1x32xf32> to vector<8x32xf32>
    %20 = arith.addf %17, %19 : vector<8x32xf32>
    %cst_22 = arith.constant 0.353553385 : f32
    %21 = vector.broadcast %cst_22 : f32 to vector<8x32xf32>
    %22 = arith.mulf %10, %21 : vector<8x32xf32>
    %c0_23 = arith.constant 0 : index
    %c0_24 = arith.constant 0 : index
    %23 = vector.load %arg10[%c0_23, %c0_24] : memref<32x32xf32, #tpu.memory_space<vmem>>, vector<32x32xf32>
    %cst_25 = arith.constant 0.000000e+00 : f32
    %24 = vector.broadcast %cst_25 : f32 to vector<8x32xf32>
    %cst_26 = arith.constant 0.000000e+00 : f32
    %25 = vector.broadcast %cst_26 : f32 to vector<8x8xf32>
    %26 = vector.extract_strided_slice %22 {offsets = [0, 0], sizes = [8, 8], strides = [1, 1]} : vector<8x32xf32> to vector<8x8xf32>
    %27 = vector.extract_strided_slice %15 {offsets = [0, 0], sizes = [8, 8], strides = [1, 1]} : vector<8x32xf32> to vector<8x8xf32>
    %28 = vector.extract_strided_slice %20 {offsets = [0, 0], sizes = [8, 8], strides = [1, 1]} : vector<8x32xf32> to vector<8x8xf32>
    %cst_27 = arith.constant dense<0.000000e+00> : vector<8x8xf32>
    %29 = tpu.matmul %26, %27, %cst_27 {dimension_numbers = #tpu.dot_dimension_numbers<[1], [1], [0], [0], [0, 0, 1, 0], [], []>} : vector<8x8xf32>, vector<8x8xf32>, vector<8x8xf32> -> vector<8x8xf32>
    %cst_28 = arith.constant dense<0xFF800000> : vector<8xf32>
    %30 = vector.multi_reduction <maximumf>, %29, %cst_28 [1] : vector<8x8xf32> to vector<8xf32>
    %31 = vector.shape_cast %30 : vector<8xf32> to vector<8x1xf32>
    %32 = vector.broadcast %31 : vector<8x1xf32> to vector<8x8xf32>
    %33 = arith.subf %29, %32 : vector<8x8xf32>
    %34 = math.exp %33 : vector<8x8xf32>
    %cst_29 = arith.constant dense<0.000000e+00> : vector<8xf32>
    %35 = vector.multi_reduction <add>, %34, %cst_29 [1] : vector<8x8xf32> to vector<8xf32>
    %36 = vector.shape_cast %35 : vector<8xf32> to vector<8x1xf32>
    %37 = tpu.reciprocal %36 : vector<8x1xf32> -> vector<8x1xf32>
    %38 = vector.broadcast %37 : vector<8x1xf32> to vector<8x8xf32>
    %39 = arith.mulf %34, %38 : vector<8x8xf32>
    %40 = arith.addf %25, %39 : vector<8x8xf32>
    %cst_30 = arith.constant dense<0.000000e+00> : vector<8x8xf32>
    %41 = tpu.matmul %39, %28, %cst_30 {dimension_numbers = #tpu.dot_dimension_numbers<[1], [0], [0], [1], [0, 0, 1, 1], [], []>} : vector<8x8xf32>, vector<8x8xf32>, vector<8x8xf32> -> vector<8x8xf32>
    %42 = vector.extract_strided_slice %23 {offsets = [0, 0], sizes = [8, 32], strides = [1, 1]} : vector<32x32xf32> to vector<8x32xf32>
    %cst_31 = arith.constant dense<0.000000e+00> : vector<8x32xf32>
    %43 = tpu.matmul %41, %42, %cst_31 {dimension_numbers = #tpu.dot_dimension_numbers<[1], [0], [0], [1], [0, 0, 1, 1], [], []>} : vector<8x8xf32>, vector<8x32xf32>, vector<8x32xf32> -> vector<8x32xf32>
    %44 = arith.addf %24, %43 : vector<8x32xf32>
    %45 = vector.extract_strided_slice %22 {offsets = [0, 8], sizes = [8, 8], strides = [1, 1]} : vector<8x32xf32> to vector<8x8xf32>
    %46 = vector.extract_strided_slice %15 {offsets = [0, 8], sizes = [8, 8], strides = [1, 1]} : vector<8x32xf32> to vector<8x8xf32>
    %47 = vector.extract_strided_slice %20 {offsets = [0, 8], sizes = [8, 8], strides = [1, 1]} : vector<8x32xf32> to vector<8x8xf32>
    %cst_32 = arith.constant dense<0.000000e+00> : vector<8x8xf32>
    %48 = tpu.matmul %45, %46, %cst_32 {dimension_numbers = #tpu.dot_dimension_numbers<[1], [1], [0], [0], [0, 0, 1, 0], [], []>} : vector<8x8xf32>, vector<8x8xf32>, vector<8x8xf32> -> vector<8x8xf32>
    %cst_33 = arith.constant dense<0xFF800000> : vector<8xf32>
    %49 = vector.multi_reduction <maximumf>, %48, %cst_33 [1] : vector<8x8xf32> to vector<8xf32>
    %50 = vector.shape_cast %49 : vector<8xf32> to vector<8x1xf32>
    %51 = vector.broadcast %50 : vector<8x1xf32> to vector<8x8xf32>
    %52 = arith.subf %48, %51 : vector<8x8xf32>
    %53 = math.exp %52 : vector<8x8xf32>
    %cst_34 = arith.constant dense<0.000000e+00> : vector<8xf32>
    %54 = vector.multi_reduction <add>, %53, %cst_34 [1] : vector<8x8xf32> to vector<8xf32>
    %55 = vector.shape_cast %54 : vector<8xf32> to vector<8x1xf32>
    %56 = tpu.reciprocal %55 : vector<8x1xf32> -> vector<8x1xf32>
    %57 = vector.broadcast %56 : vector<8x1xf32> to vector<8x8xf32>
    %58 = arith.mulf %53, %57 : vector<8x8xf32>
    %59 = arith.addf %40, %58 : vector<8x8xf32>
    %cst_35 = arith.constant dense<0.000000e+00> : vector<8x8xf32>
    %60 = tpu.matmul %58, %47, %cst_35 {dimension_numbers = #tpu.dot_dimension_numbers<[1], [0], [0], [1], [0, 0, 1, 1], [], []>} : vector<8x8xf32>, vector<8x8xf32>, vector<8x8xf32> -> vector<8x8xf32>
    %61 = vector.extract_strided_slice %23 {offsets = [8, 0], sizes = [8, 32], strides = [1, 1]} : vector<32x32xf32> to vector<8x32xf32>
    %cst_36 = arith.constant dense<0.000000e+00> : vector<8x32xf32>
    %62 = tpu.matmul %60, %61, %cst_36 {dimension_numbers = #tpu.dot_dimension_numbers<[1], [0], [0], [1], [0, 0, 1, 1], [], []>} : vector<8x8xf32>, vector<8x32xf32>, vector<8x32xf32> -> vector<8x32xf32>
    %63 = arith.addf %44, %62 : vector<8x32xf32>
    %64 = vector.extract_strided_slice %22 {offsets = [0, 16], sizes = [8, 8], strides = [1, 1]} : vector<8x32xf32> to vector<8x8xf32>
    %65 = vector.extract_strided_slice %15 {offsets = [0, 16], sizes = [8, 8], strides = [1, 1]} : vector<8x32xf32> to vector<8x8xf32>
    %66 = vector.extract_strided_slice %20 {offsets = [0, 16], sizes = [8, 8], strides = [1, 1]} : vector<8x32xf32> to vector<8x8xf32>
    %cst_37 = arith.constant dense<0.000000e+00> : vector<8x8xf32>
    %67 = tpu.matmul %64, %65, %cst_37 {dimension_numbers = #tpu.dot_dimension_numbers<[1], [1], [0], [0], [0, 0, 1, 0], [], []>} : vector<8x8xf32>, vector<8x8xf32>, vector<8x8xf32> -> vector<8x8xf32>
    %cst_38 = arith.constant dense<0xFF800000> : vector<8xf32>
    %68 = vector.multi_reduction <maximumf>, %67, %cst_38 [1] : vector<8x8xf32> to vector<8xf32>
    %69 = vector.shape_cast %68 : vector<8xf32> to vector<8x1xf32>
    %70 = vector.broadcast %69 : vector<8x1xf32> to vector<8x8xf32>
    %71 = arith.subf %67, %70 : vector<8x8xf32>
    %72 = math.exp %71 : vector<8x8xf32>
    %cst_39 = arith.constant dense<0.000000e+00> : vector<8xf32>
    %73 = vector.multi_reduction <add>, %72, %cst_39 [1] : vector<8x8xf32> to vector<8xf32>
    %74 = vector.shape_cast %73 : vector<8xf32> to vector<8x1xf32>
    %75 = tpu.reciprocal %74 : vector<8x1xf32> -> vector<8x1xf32>
    %76 = vector.broadcast %75 : vector<8x1xf32> to vector<8x8xf32>
    %77 = arith.mulf %72, %76 : vector<8x8xf32>
    %78 = arith.addf %59, %77 : vector<8x8xf32>
    %cst_40 = arith.constant dense<0.000000e+00> : vector<8x8xf32>
    %79 = tpu.matmul %77, %66, %cst_40 {dimension_numbers = #tpu.dot_dimension_numbers<[1], [0], [0], [1], [0, 0, 1, 1], [], []>} : vector<8x8xf32>, vector<8x8xf32>, vector<8x8xf32> -> vector<8x8xf32>
    %80 = vector.extract_strided_slice %23 {offsets = [16, 0], sizes = [8, 32], strides = [1, 1]} : vector<32x32xf32> to vector<8x32xf32>
    %cst_41 = arith.constant dense<0.000000e+00> : vector<8x32xf32>
    %81 = tpu.matmul %79, %80, %cst_41 {dimension_numbers = #tpu.dot_dimension_numbers<[1], [0], [0], [1], [0, 0, 1, 1], [], []>} : vector<8x8xf32>, vector<8x32xf32>, vector<8x32xf32> -> vector<8x32xf32>
    %82 = arith.addf %63, %81 : vector<8x32xf32>
    %83 = vector.extract_strided_slice %22 {offsets = [0, 24], sizes = [8, 8], strides = [1, 1]} : vector<8x32xf32> to vector<8x8xf32>
    %84 = vector.extract_strided_slice %15 {offsets = [0, 24], sizes = [8, 8], strides = [1, 1]} : vector<8x32xf32> to vector<8x8xf32>
    %85 = vector.extract_strided_slice %20 {offsets = [0, 24], sizes = [8, 8], strides = [1, 1]} : vector<8x32xf32> to vector<8x8xf32>
    %cst_42 = arith.constant dense<0.000000e+00> : vector<8x8xf32>
    %86 = tpu.matmul %83, %84, %cst_42 {dimension_numbers = #tpu.dot_dimension_numbers<[1], [1], [0], [0], [0, 0, 1, 0], [], []>} : vector<8x8xf32>, vector<8x8xf32>, vector<8x8xf32> -> vector<8x8xf32>
    %cst_43 = arith.constant dense<0xFF800000> : vector<8xf32>
    %87 = vector.multi_reduction <maximumf>, %86, %cst_43 [1] : vector<8x8xf32> to vector<8xf32>
    %88 = vector.shape_cast %87 : vector<8xf32> to vector<8x1xf32>
    %89 = vector.broadcast %88 : vector<8x1xf32> to vector<8x8xf32>
    %90 = arith.subf %86, %89 : vector<8x8xf32>
    %91 = math.exp %90 : vector<8x8xf32>
    %cst_44 = arith.constant dense<0.000000e+00> : vector<8xf32>
    %92 = vector.multi_reduction <add>, %91, %cst_44 [1] : vector<8x8xf32> to vector<8xf32>
    %93 = vector.shape_cast %92 : vector<8xf32> to vector<8x1xf32>
    %94 = tpu.reciprocal %93 : vector<8x1xf32> -> vector<8x1xf32>
    %95 = vector.broadcast %94 : vector<8x1xf32> to vector<8x8xf32>
    %96 = arith.mulf %91, %95 : vector<8x8xf32>
    %97 = arith.addf %78, %96 : vector<8x8xf32>
    %cst_45 = arith.constant dense<0.000000e+00> : vector<8x8xf32>
    %98 = tpu.matmul %96, %85, %cst_45 {dimension_numbers = #tpu.dot_dimension_numbers<[1], [0], [0], [1], [0, 0, 1, 1], [], []>} : vector<8x8xf32>, vector<8x8xf32>, vector<8x8xf32> -> vector<8x8xf32>
    %99 = vector.extract_strided_slice %23 {offsets = [24, 0], sizes = [8, 32], strides = [1, 1]} : vector<32x32xf32> to vector<8x32xf32>
    %cst_46 = arith.constant dense<0.000000e+00> : vector<8x32xf32>
    %100 = tpu.matmul %98, %99, %cst_46 {dimension_numbers = #tpu.dot_dimension_numbers<[1], [0], [0], [1], [0, 0, 1, 1], [], []>} : vector<8x8xf32>, vector<8x32xf32>, vector<8x32xf32> -> vector<8x32xf32>
    %101 = arith.addf %82, %100 : vector<8x32xf32>
    %c0_47 = arith.constant 0 : index
    %c0_48 = arith.constant 0 : index
    %102 = vector.load %arg11[%c0_47, %c0_48] : memref<1x32xf32, #tpu.memory_space<vmem>>, vector<1x32xf32>
    %103 = vector.broadcast %102 : vector<1x32xf32> to vector<8x32xf32>
    %104 = arith.addf %101, %103 : vector<8x32xf32>
    %105 = arith.addf %104, %1 : vector<8x32xf32>
    %cst_49 = arith.constant dense<0.000000e+00> : vector<8xf32>
    %106 = vector.multi_reduction <add>, %105, %cst_49 [1] : vector<8x32xf32> to vector<8xf32>
    %107 = vector.shape_cast %106 : vector<8xf32> to vector<8x1xf32>
    %cst_50 = arith.constant 3.200000e+01 : f32
    %108 = vector.broadcast %cst_50 : f32 to vector<8x1xf32>
    %109 = arith.divf %107, %108 : vector<8x1xf32>
    %110 = vector.broadcast %109 : vector<8x1xf32> to vector<8x32xf32>
    %111 = arith.subf %105, %110 : vector<8x32xf32>
    %112 = arith.mulf %111, %111 : vector<8x32xf32>
    %cst_51 = arith.constant dense<0.000000e+00> : vector<8xf32>
    %113 = vector.multi_reduction <add>, %112, %cst_51 [1] : vector<8x32xf32> to vector<8xf32>
    %114 = vector.shape_cast %113 : vector<8xf32> to vector<8x1xf32>
    %cst_52 = arith.constant 3.200000e+01 : f32
    %115 = vector.broadcast %cst_52 : f32 to vector<8x1xf32>
    %116 = arith.divf %114, %115 : vector<8x1xf32>
    %117 = vector.broadcast %109 : vector<8x1xf32> to vector<8x32xf32>
    %118 = arith.subf %105, %117 : vector<8x32xf32>
    %cst_53 = arith.constant 9.99999974E-6 : f32
    %119 = vector.broadcast %cst_53 : f32 to vector<8x1xf32>
    %120 = arith.addf %116, %119 : vector<8x1xf32>
    %121 = math.rsqrt %120 : vector<8x1xf32>
    %122 = vector.broadcast %121 : vector<8x1xf32> to vector<8x32xf32>
    %123 = arith.mulf %118, %122 : vector<8x32xf32>
    %c0_54 = arith.constant 0 : index
    %c0_55 = arith.constant 0 : index
    %124 = vector.load %arg12[%c0_54, %c0_55] : memref<1x32xf32, #tpu.memory_space<vmem>>, vector<1x32xf32>
    %125 = vector.broadcast %124 : vector<1x32xf32> to vector<8x32xf32>
    %126 = arith.mulf %123, %125 : vector<8x32xf32>
    %c0_56 = arith.constant 0 : index
    %c0_57 = arith.constant 0 : index
    %127 = vector.load %arg13[%c0_56, %c0_57] : memref<1x32xf32, #tpu.memory_space<vmem>>, vector<1x32xf32>
    %128 = vector.broadcast %127 : vector<1x32xf32> to vector<8x32xf32>
    %129 = arith.addf %126, %128 : vector<8x32xf32>
    %c0_58 = arith.constant 0 : index
    %c0_59 = arith.constant 0 : index
    %c0_60 = arith.constant 0 : index
    %130 = vector.load %arg14[%c0_58, %c0_59, %c0_60] : memref<1x8x32xf32, #tpu.memory_space<vmem>>, vector<1x8x32xf32>
    %131 = vector.shape_cast %130 : vector<1x8x32xf32> to vector<8x32xf32>
    %132 = vector.shape_cast %129 : vector<8x32xf32> to vector<1x8x32xf32>
    tpu.vector_store %arg14[%c0_58, %c0_59, %c0_60], %132 {strides = array<i32>} : memref<1x8x32xf32, #tpu.memory_space<vmem>>, vector<1x8x32xf32>,
    %cst_61 = arith.constant 2.500000e-01 : f32
    %133 = vector.broadcast %cst_61 : f32 to vector<8x8xf32>
    %134 = arith.mulf %97, %133 : vector<8x8xf32>
    %c0_62 = arith.constant 0 : index
    %c0_63 = arith.constant 0 : index
    %c0_64 = arith.constant 0 : index
    %135 = vector.load %arg15[%c0_62, %c0_63, %c0_64] : memref<1x8x8xf32, #tpu.memory_space<vmem>>, vector<1x8x8xf32>
    %136 = vector.shape_cast %135 : vector<1x8x8xf32> to vector<8x8xf32>
    %137 = vector.shape_cast %134 : vector<8x8xf32> to vector<1x8x8xf32>
    tpu.vector_store %arg15[%c0_62, %c0_63, %c0_64], %137 {strides = array<i32>} : memref<1x8x8xf32, #tpu.memory_space<vmem>>, vector<1x8x8xf32>,
    return
  }
  func.func @transform_0(%arg0: i32) -> (i32, i32, i32) {
    %c0_i32 = arith.constant 0 : i32
    %c0_i32_0 = arith.constant 0 : i32
    %c0_i32_1 = arith.constant 0 : i32
    return %arg0, %c0_i32, %c0_i32_0 : i32, i32, i32
  }
  func.func @transform_1(%arg0: i32) -> (i32, i32, i32) {
    %c0_i32 = arith.constant 0 : i32
    %c0_i32_0 = arith.constant 0 : i32
    %c0_i32_1 = arith.constant 0 : i32
    return %arg0, %c0_i32, %c0_i32_0 : i32, i32, i32
  }
  func.func @transform_2(%arg0: i32) -> (i32, i32, i32) {
    %c0_i32 = arith.constant 0 : i32
    %c0_i32_0 = arith.constant 0 : i32
    %c0_i32_1 = arith.constant 0 : i32
    return %arg0, %c0_i32, %c0_i32_0 : i32, i32, i32
  }
  func.func @transform_3(%arg0: i32) -> (i32, i32) {
    %c0_i32 = arith.constant 0 : i32
    %c0_i32_0 = arith.constant 0 : i32
    %c0_i32_1 = arith.constant 0 : i32
    return %c0_i32, %c0_i32_0 : i32, i32
  }
  func.func @transform_4(%arg0: i32) -> (i32, i32) {
    %c0_i32 = arith.constant 0 : i32
    %c0_i32_0 = arith.constant 0 : i32
    %c0_i32_1 = arith.constant 0 : i32
    return %c0_i32, %c0_i32_0 : i32, i32
  }
  func.func @transform_5(%arg0: i32) -> (i32, i32) {
    %c0_i32 = arith.constant 0 : i32
    %c0_i32_0 = arith.constant 0 : i32
    %c0_i32_1 = arith.constant 0 : i32
    return %c0_i32, %c0_i32_0 : i32, i32
  }
  func.func @transform_6(%arg0: i32) -> (i32, i32) {
    %c0_i32 = arith.constant 0 : i32
    %c0_i32_0 = arith.constant 0 : i32
    %c0_i32_1 = arith.constant 0 : i32
    return %c0_i32, %c0_i32_0 : i32, i32
  }
  func.func @transform_7(%arg0: i32) -> (i32, i32) {
    %c0_i32 = arith.constant 0 : i32
    %c0_i32_0 = arith.constant 0 : i32
    %c0_i32_1 = arith.constant 0 : i32
    return %c0_i32, %c0_i32_0 : i32, i32
  }
  func.func @transform_8(%arg0: i32) -> (i32, i32) {
    %c0_i32 = arith.constant 0 : i32
    %c0_i32_0 = arith.constant 0 : i32
    %c0_i32_1 = arith.constant 0 : i32
    return %c0_i32, %c0_i32_0 : i32, i32
  }
  func.func @transform_9(%arg0: i32) -> (i32, i32) {
    %c0_i32 = arith.constant 0 : i32
    %c0_i32_0 = arith.constant 0 : i32
    %c0_i32_1 = arith.constant 0 : i32
    return %c0_i32, %c0_i32_0 : i32, i32
  }
  func.func @transform_10(%arg0: i32) -> (i32, i32) {
    %c0_i32 = arith.constant 0 : i32
    %c0_i32_0 = arith.constant 0 : i32
    %c0_i32_1 = arith.constant 0 : i32
    return %c0_i32, %c0_i32_0 : i32, i32
  }
  func.func @transform_11(%arg0: i32) -> (i32, i32) {
    %c0_i32 = arith.constant 0 : i32
    %c0_i32_0 = arith.constant 0 : i32
    %c0_i32_1 = arith.constant 0 : i32
    return %c0_i32, %c0_i32_0 : i32, i32
  }
  func.func @transform_12(%arg0: i32) -> (i32, i32) {
    %c0_i32 = arith.constant 0 : i32
    %c0_i32_0 = arith.constant 0 : i32
    %c0_i32_1 = arith.constant 0 : i32
    return %c0_i32, %c0_i32_0 : i32, i32
  }
  func.func @transform_13(%arg0: i32) -> (i32, i32, i32) {
    %c0_i32 = arith.constant 0 : i32
    %c0_i32_0 = arith.constant 0 : i32
    %c0_i32_1 = arith.constant 0 : i32
    return %arg0, %c0_i32, %c0_i32_0 : i32, i32, i32
  }
  func.func @transform_14(%arg0: i32) -> (i32, i32, i32) {
    %c0_i32 = arith.constant 0 : i32
    %c0_i32_0 = arith.constant 0 : i32
    %c0_i32_1 = arith.constant 0 : i32
    return %arg0, %c0_i32, %c0_i32_0 : i32, i32, i32
  }
}

</mosaic_0001>

<bundles_post_ra>
// kernel: tpu_custom_call.1
= control target key start
LH: loop header
LB: loop body
LE: loop exit
PB: predicated region body
PF: predicated region fallthrough
CT: control target
= control target key end

     0   :  { %s3343_s0 = inlined_call_operand.hbm [shape: f32[2,8,32], index: 0, kind: input, shape index: {}]   ;;  %s3344_s1 = inlined_call_operand.hbm [shape: f32[2,8,32], index: 1, kind: input, shape index: {}]   ;;  %s3345_s2 = inlined_call_operand.hbm [shape: f32[2,8,32], index: 2, kind: input, shape index: {}]   ;;  %s3346_s3 = inlined_call_operand.hbm [shape: f32[32,32], index: 3, kind: input, shape index: {}]   ;;  %s3347_s4 = inlined_call_operand.hbm [shape: f32[32,32], index: 4, kind: input, shape index: {}]   ;;  %s3348_s5 = inlined_call_operand.hbm [shape: f32[32,32], index: 5, kind: input, shape index: {}]   ;;  %s3349_s6 = inlined_call_operand.vmem [shape: f32[1,32], index: 6, kind: input, shape index: {}]   ;;  %s3350_s7 = inlined_call_operand.vmem [shape: f32[1,32], index: 7, kind: input, shape index: {}]   ;;  %s3351_s8 = inlined_call_operand.hbm [shape: f32[1,32], index: 8, kind: input, shape index: {}]   ;;  %s3352_s9 = inlined_call_operand.vmem [shape: f32[32,32], index: 9, kind: input, shape index: {}]   ;;  %s3353_s10 = inlined_call_operand.vmem [shape: f32[1,32], index: 10, kind: input, shape index: {}]   ;;  %s3354_s11 = inlined_call_operand.vmem [shape: f32[1,32], index: 11, kind: input, shape index: {}]   ;;  %s3355_s12 = inlined_call_operand.vmem [shape: f32[1,32], index: 12, kind: input, shape index: {}]   ;;  %s3356_s13 = inlined_call_operand.hbm [shape: f32[2,8,32], index: 13, kind: output, shape index: {0}]   ;;  %s3357_s14 = inlined_call_operand.hbm [shape: f32[2,8,8], index: 14, kind: output, shape index: {1}]  }
   0x1   :  { %3383 = sst [smem:[#allocation29_spill]] %s3344_s1 }
   0x2   :  { %3384 = sst [smem:[#allocation30_spill]] %s3346_s3 }
   0x3   :  { %3385 = sst [smem:[#allocation31_spill]] %s3348_s5 }
   0x4   :  { %3386 = sst [smem:[#allocation32_spill]] %s3349_s6 }
   0x5   :  { %3387 = sst [smem:[#allocation33_spill]] %s3352_s9 }
   0x6   :  { %3388 = sst [smem:[#allocation34_spill]] %s3353_s10 }
   0x7   :  { %3389 = sst [smem:[#allocation35_spill]] %s3354_s11 }
   0x8   :  { %3390 = sst [smem:[#allocation36_spill]] %s3355_s12 }
   0x9   :  { %3391 = sst [smem:[#allocation37_spill]] %s3356_s13 }
   0xa   :  { %3392 = sst [smem:[#allocation38_spill]] %s3357_s14 }
   0xb   :  { %20 = vsyncpa [#allocation3], 0 }
   0xc   :  { %22 = vsyncpa [#allocation3 + $0x1], 0 }
   0xd   :  { %23 = vsyncpa [#allocation6], 0 }
   0xe   :  { %25 = vsyncpa [#allocation6 + $0x1], 0 }
   0xf   :  { %26 = vsyncpa [#allocation9], 0 }
  0x10   :  { %27 = vsyncpa [#allocation12], 0 }
  0x11   :  { %28 = vsyncpa [#allocation4], 0 }
  0x12   :  { %30 = vsyncpa [#allocation4 + $0x1], 0 }
  0x13   :  { %31 = vsyncpa [#allocation16], 0 }
  0x14   :  { %33 = vsyncpa [#allocation16 + $0x1], 0  ;;  %s2832_s29 = smov 0   ;;  %s2834_s30 = smov 0  }
  0x15   :  { %s2836_s15 = smov 0   ;;  %s2838_s16 = smov 0  }
  0x16 LB: > { %3393 = sst [smem:[#allocation23_spill]] %s2726_s29  ;;  %s2740_s17 = smov [#allocation8]   ;;  %s2738_s16 = sphi %s2838_s16, %s3439_s16   ;;  %s2734_s15 = sphi %s2836_s15, %s3443_s15   ;;  %s2730_s30 = sphi %s2834_s30, %s3442_s30   ;;  %s2726_s29 = sphi %s2832_s29, %s3441_s29  }
  0x17   : > { %3394 = sst [smem:[#allocation24_spill]] %s2738_s16  ;;  %s396_s18 = sshll.u32 %s2740_s17, 4  ;;  %s2858_s18 = int_to_ptr.vmem [resolvable:$true] %s396_s18 }
  0x18   : > { %s2853_s19 = sadd.s32 4294967295, %s2738_s16   ;;  %p2095_p0 = scmp.ge.s32.totalorder %s2738_s16, 1 }
  0x19   : > { %p3369_p1 = scmp.eq.s32.totalorder %s2853_s19, 0  ;;  %p384_p2 = scmp.lt.s32.totalorder %s2738_s16, 3 }
  0x1a   : > { %s2741_s21 = smov [#allocation11]   ;;  %s3397_s3 = sld [smem:[#allocation30_spill]] }
  0x1b   : > { %p2860_p3 = pnand %p2095_p0, %p384_p2  ;;  %s422_s22 = sshll.u32 %s2741_s21, 4  ;;  %s2873_s22 = int_to_ptr.vmem [resolvable:$true] %s422_s22 }
  0x1d   : > { %s3395_s20 = scalar_select %p2860_p3, 1, 0 }
  0x1e   : > { %p2324_p5 = pneg %p2860_p3 }
  0x20   : > { %p2869_p6 = pnand %p2324_p5, %p3369_p1  ;;  %s2426_s26 = scalar_lea.hbm %s3397_s3, 512 }
  0x21   : > { %p2427_p7 = scmp.ne.s32.totalorder %s3397_s3, %s2426_s26  ;;  %p2433_p11 = scmp.lt.u32.totalorder %s2426_s26, %s3397_s3 }
  0x22   : > { %s3396_s23 = scalar_select %p2869_p6, 1, 0 }
  0x23   : > { %p2883_p8 = pneg %p2869_p6 }
  0x25   : > { %s3398_s17 = scalar_select %p2883_p8, 1, 0 }
  0x26   : > { %p2429_p9 = pnand %p2883_p8, %p2427_p7 }
  0x28   : > { %p2430_p10 = pneg %p2429_p9 }
  0x2a   : > { %p2435_p12 = pnand %p2433_p11, %p2430_p10 }
  0x2c   : > { %2438 = shalt.err (!%p2435_p12)
}
  0x2d   : > { %s2439_s24 = scalar_lea.vmem %s2858_s18, 512  ;;  %p2447_p5 = scmp.lt.s32.totalorder %s2858_s18, %s2858_s18 }
  0x2e   : > { %p2440_p13 = scmp.ne.s32.totalorder %s2858_s18, %s2439_s24  ;;  %p2448_p4 = scmp.lt.s32.totalorder %s2439_s24, %s2439_s24 }
  0x30   : > { %p2442_p0 = pnand %p2440_p13, %p2883_p8  ;;  %p2449_p7 = por %p2448_p4, %p2447_p5 }
  0x32   : > { %p2443_p2 = pneg %p2442_p0 }
  0x34   : > { %p2450_p9 = pnand %p2449_p7, %p2443_p2 }
  0x36   : > { %2453 = shalt.err (!%p2450_p9)
}
  0x37   : > { %s3361_s25 = smov 128   ;;  %s3362_s13 = smov 8  }
  0x38   : > { %2327 = dma.hbm_to_vmem [thread:$0]  (!%p2869_p6), %s3397_s3, 512, %s2858_s18, [#allocation9], %s3361_s25, %s3361_s25, %s3362_s13  }
  0x39   : > { %s3399_s5 = sld [smem:[#allocation31_spill]] }
  0x3f   : > { %s2454_s24 = scalar_lea.hbm %s3399_s5, 512 }
  0x40   : > { %p2455_p4 = scmp.ne.s32.totalorder %s3399_s5, %s2454_s24  ;;  %p2461_p12 = scmp.lt.u32.totalorder %s2454_s24, %s3399_s5 }
  0x42   : > { %p2457_p10 = pnand %p2455_p4, %p2883_p8 }
  0x44   : > { %p2458_p11 = pneg %p2457_p10 }
  0x46   : > { %p2463_p13 = pnand %p2461_p12, %p2458_p11 }
  0x48   : > { %2466 = shalt.err (!%p2463_p13)
}
  0x49   : > { %s2467_s18 = scalar_lea.vmem %s2873_s22, 512  ;;  %p2475_p7 = scmp.lt.s32.totalorder %s2873_s22, %s2873_s22 }
  0x4a   : > { %p2468_p0 = scmp.ne.s32.totalorder %s2873_s22, %s2467_s18  ;;  %p2476_p9 = scmp.lt.s32.totalorder %s2467_s18, %s2467_s18 }
  0x4c   : > { %p2470_p2 = pnand %p2468_p0, %p2883_p8  ;;  %p2477_p4 = por %p2476_p9, %p2475_p7 }
  0x4e   : > { %p2471_p5 = pneg %p2470_p2 }
  0x50   : > { %p2478_p10 = pnand %p2477_p4, %p2471_p5 }
  0x52   : > { %2481 = shalt.err (!%p2478_p10)
}
  0x53   : > { %2333 = dma.hbm_to_vmem [thread:$0]  (!%p2869_p6), %s3399_s5, 512, %s2873_s22, [#allocation12], %s3361_s25, %s3361_s25, %s3362_s13  }
  0x54   : > { %s2094_s12 = sadd.s32 4294967294, %s2738_s16   ;;  %s2935_s14 = sadd.s32 1, %s2738_s16  }
  0x55   : > { %3400 = sst [smem:[#allocation25_spill]] %s2935_s14  ;;  %s43_s26 = ssub.s32 %s2738_s16, %s2935_s14 }
  0x56   : > { %s46_s27 = sadd.s32 1, %s2734_s15  ;;  %p44_p11 = scmp.eq.s32.totalorder %s43_s26, 0 }
  0x57   : > { %p53_p12 = scmp.ne.s32.totalorder %s2734_s15, %s2730_s30  ;;  %p54_p13 = scmp.eq.s32.totalorder %s2738_s16, 0 }
  0x58   : > { %p59_p0 = scmp.ne.s32.totalorder %s2730_s30, %s2726_s29  ;;  %p345_p7 = scmp.eq.s32.totalorder %s2853_s19, 1 }
  0x59   : > { %s2946_s28 = scalar_select %p44_p11, %s2734_s15, %s46_s27  }
  0x5a   : > { %p55_p2 = por %p54_p13, %p53_p12  ;;  %p2950_p5 = por %p3369_p1, %p59_p0 }
  0x5b   : > { %3401 = sst [smem:[#allocation26_spill]] %s2946_s28  ;;  %p351_p9 = scmp.eq.s32.totalorder %s2094_s12, 1 }
  0x5c   : > { %s3402_s21 = scalar_select %p2950_p5, 1, 0 }
  0x5d   : > { %p2358_p4 = scmp.lt.s32.totalorder %s2738_s16, 2  ;;  %s3363_s22 = sand.u32 1, %s2734_s15  }
  0x5e   : > { %p2957_p10 = por %p345_p7, %p53_p12  ;;  %p2961_p3 = por %p351_p9, %p59_p0 }
  0x5f   : > { %s2967_s10 = sshll.u32 %s3363_s22, 3  ;;  %s2970_s11 = sshll.u32 %s2738_s16, 7 }
  0x60   : > { %s3403_s24 = scalar_select %p2957_p10, 1, 0 }
  0x61   : > { %s3405_s18 = scalar_select %p2961_p3, 1, 0 }
  0x62   : > { %3404 = sst [smem:[#allocation27_spill]] %s3403_s24  ;;  %p2972_p11 = pnand %p2358_p4, %p55_p2 }
  0x63   : > { %3406 = sst [smem:[#allocation28_spill]] %s3405_s18  ;;  %s483_s12 = sand.u32 1, %s2738_s16  }
  0x64   : > { %s3407_s26 = scalar_select %p2972_p11, 1, 0 }
  0x65   : > { %s3408_s1 = sld [smem:[#allocation29_spill]]  ;;  %s487_s22 = scalar_lea.vmem [#allocation5], %s2967_s10 }
  0x66   : > { %s494_s3 = sshll.u32 %s487_s22, 4  ;;  %s2744_s5 = smov [#allocation10]   ;;  %s2984_s3 = int_to_ptr.vmem [resolvable:$true] %s494_s3 }
  0x67   : > { %s2986_s28 = sshll.u32 %s2744_s5, 4  ;;  %s2988_s14 = scalar_lea.sflag [#allocation6], %s483_s12  ;;  %s410_s28 = int_to_ptr.vmem [resolvable:$true] %s2986_s28 }
  0x68   : > { %p2994_p13 = pneg %p2972_p11 }
  0x6a   : > { %s3409_s25 = scalar_select %p2994_p13, 1, 0 }
  0x6b   : > { %s2981_s13 = scalar_lea.hbm %s3408_s1, %s2970_s11  ;;  %s2487_s16 = scalar_lea.hbm %s3408_s1, 256 }
  0x6c   : > { %s2482_s18 = scalar_lea.hbm %s2981_s13, 128  ;;  %p2488_p7 = scmp.lt.u32.totalorder %s2981_s13, %s3408_s1 }
  0x6d   : > { %p2483_p12 = scmp.ne.s32.totalorder %s2981_s13, %s2482_s18  ;;  %p2489_p9 = scmp.lt.u32.totalorder %s2487_s16, %s2482_s18 }
  0x6e   : > { %p2491_p1 = scmp.lt.u32.totalorder %s2482_s18, %s2981_s13 }
  0x6f   : > { %p2485_p0 = pnand %p2994_p13, %p2483_p12  ;;  %p2490_p4 = por %p2489_p9, %p2488_p7 }
  0x71   : > { %p2486_p2 = pneg %p2485_p0  ;;  %p2492_p3 = por %p2491_p1, %p2490_p4 }
  0x73   : > { %p2493_p10 = pnand %p2492_p3, %p2486_p2 }
  0x75   : > { %2496 = shalt.err (!%p2493_p10)
}
  0x76   : > { %s2497_s12 = scalar_lea.vmem %s2984_s3, 128  ;;  %s2745_s27 = smov [#allocation5]  }
  0x77   : > { %p2498_p12 = scmp.ne.s32.totalorder %s2984_s3, %s2497_s12  ;;  %s2502_s22 = sshll.u32 %s2745_s27, 4  ;;  %s2503_s22 = int_to_ptr.vmem [resolvable:$false] %s2502_s22 }
  0x78   : > { %s2504_s29 = scalar_lea.vmem %s2503_s22, 256  ;;  %p2505_p6 = scmp.lt.s32.totalorder %s2984_s3, %s2503_s22 }
  0x79   : > { %p2500_p0 = pnand %p2498_p12, %p2994_p13  ;;  %p2506_p8 = scmp.lt.s32.totalorder %s2504_s29, %s2497_s12 }
  0x7b   : > { %p2501_p5 = pneg %p2500_p0  ;;  %p2507_p7 = por %p2506_p8, %p2505_p6 }
  0x7d   : > { %p2508_p9 = pnand %p2507_p7, %p2501_p5 }
  0x7f   : > { %2511 = shalt.err (!%p2508_p9)
}
  0x80   : > { %2343 = dma.hbm_to_vmem [thread:$0]  (!%p2972_p11), %s2981_s13, 128, %s2984_s3, %s2988_s14  }
  0x81   : > { %s2512_s5 = scalar_lea.hbm %s3347_s4, 512  ;;  %p3410_p3 = scmp.ne.s32.totalorder %s3398_s17, 0 }
  0x82   : > { %p2513_p1 = scmp.ne.s32.totalorder %s3347_s4, %s2512_s5  ;;  %p2519_p5 = scmp.lt.u32.totalorder %s2512_s5, %s3347_s4 }
  0x84   : > { %p2515_p6 = pnand %p2513_p1, %p3410_p3 }
  0x86   : > { %p2516_p8 = pneg %p2515_p6 }
  0x88   : > { %p2521_p10 = pnand %p2519_p5, %p2516_p8 }
  0x8a   : > { %2524 = shalt.err (!%p2521_p10)
}
  0x8b   : > { %s2525_s29 = scalar_lea.vmem %s410_s28, 512  ;;  %p2533_p0 = scmp.lt.s32.totalorder %s410_s28, %s410_s28 }
  0x8c   : > { %p2526_p2 = scmp.ne.s32.totalorder %s410_s28, %s2525_s29  ;;  %p2534_p7 = scmp.lt.s32.totalorder %s2525_s29, %s2525_s29 }
  0x8e   : > { %p2528_p4 = pnand %p2526_p2, %p3410_p3  ;;  %p2535_p9 = por %p2534_p7, %p2533_p0 }
  0x90   : > { %p2529_p12 = pneg %p2528_p4 }
  0x92   : > { %p2536_p11 = pnand %p2535_p9, %p2529_p12 }
  0x94   : > { %2539 = shalt.err (!%p2536_p11)
}
  0x95   : > { %p3411_p1 = scmp.ne.s32.totalorder %s3396_s23, 0  ;;  %s3412_s1 = smov 8  }
  0x96   : > { %s3413_s3 = smov 128   ;;  %s2746_s18 = smov [#allocation13]  }
  0x97   : > { %2330 = dma.hbm_to_vmem [thread:$0]  (!%p3411_p1), %s3347_s4, 512, %s410_s28, [#allocation9], %s3413_s3, %s3413_s3, %s3412_s1  }
  0x98   : > { %s442_s5 = sshll.u32 %s2746_s18, 4  ;;  %s2540_s22 = scalar_lea.hbm %s3351_s8, 16  ;;  %s443_s5 = int_to_ptr.vmem [resolvable:$true] %s442_s5 }
  0x99   : > { %p2541_p11 = scmp.ne.s32.totalorder %s3351_s8, %s2540_s22  ;;  %p2547_p5 = scmp.lt.u32.totalorder %s2540_s22, %s3351_s8 }
  0x9b   : > { %p2543_p6 = pnand %p2541_p11, %p3410_p3 }
  0x9d   : > { %p2544_p8 = pneg %p2543_p6 }
  0x9f   : > { %p2549_p10 = pnand %p2547_p5, %p2544_p8 }
  0xa1   : > { %2552 = shalt.err (!%p2549_p10)
}
  0xa2   : > { %s2553_s28 = scalar_lea.vmem %s443_s5, 16  ;;  %s2560_s1 = scalar_lea.vmem %s443_s5, 32 }
  0xa3   : > { %p2554_p2 = scmp.ne.s32.totalorder %s443_s5, %s2553_s28  ;;  %p2561_p0 = scmp.lt.s32.totalorder %s443_s5, %s443_s5 }
  0xa4   : > { %p2562_p7 = scmp.lt.s32.totalorder %s2560_s1, %s2553_s28 }
  0xa5   : > { %p2556_p4 = pnand %p2554_p2, %p3410_p3 }
  0xa6   : > { %p2563_p9 = por %p2562_p7, %p2561_p0 }
  0xa7   : > { %p2557_p12 = pneg %p2556_p4 }
  0xa9   : > { %p2564_p13 = pnand %p2563_p9, %p2557_p12 }
  0xab   : > { %2567 = shalt.err (!%p2564_p13)
}
  0xac   : > { %2336 = dma.hbm_to_vmem [thread:$0]  (!%p3411_p1), %s3351_s8, 16, %s443_s5, [#allocation12]  }
  0xad   : > { %s3062_s17 = scalar_lea.hbm %s3343_s0, %s2970_s11  ;;  %s469_s13 = scalar_lea.vmem [#allocation2], %s2967_s10 }
  0xae   : > { %s476_s16 = sshll.u32 %s469_s13, 4  ;;  %s3414_s23 = sand.u32 1, %s2734_s15   ;;  %s477_s16 = int_to_ptr.vmem [resolvable:$true] %s476_s16 }
  0xaf   : > { %s466_s18 = scalar_lea.sflag [#allocation3], %s3414_s23  ;;  %s2568_s27 = scalar_lea.hbm %s3062_s17, 128 }
  0xb0   : > { %p2569_p13 = scmp.ne.s32.totalorder %s3062_s17, %s2568_s27  ;;  %p3415_p3 = scmp.ne.s32.totalorder %s3409_s25, 0 }
  0xb1   : > { %s2573_s22 = scalar_lea.hbm %s3343_s0, 256  ;;  %p2574_p1 = scmp.lt.u32.totalorder %s3062_s17, %s3343_s0 }
  0xb2   : > { %p2571_p11 = pnand %p2569_p13, %p3415_p3  ;;  %p2575_p8 = scmp.lt.u32.totalorder %s2573_s22, %s2568_s27 }
  0xb3   : > { %p2577_p10 = scmp.lt.u32.totalorder %s2568_s27, %s3062_s17 }
  0xb4   : > { %p2572_p6 = pneg %p2571_p11  ;;  %p2576_p5 = por %p2575_p8, %p2574_p1 }
  0xb6   : > { %p2578_p2 = por %p2577_p10, %p2576_p5 }
  0xb8   : > { %p2579_p4 = pnand %p2578_p2, %p2572_p6 }
  0xba   : > { %2582 = shalt.err (!%p2579_p4)
}
  0xbb   : > { %s2583_s1 = scalar_lea.vmem %s477_s16, 128  ;;  %s2747_s24 = smov [#allocation2]  }
  0xbc   : > { %p2584_p12 = scmp.ne.s32.totalorder %s477_s16, %s2583_s1  ;;  %s2588_s3 = sshll.u32 %s2747_s24, 4  ;;  %s2589_s3 = int_to_ptr.vmem [resolvable:$false] %s2588_s3 }
  0xbd   : > { %s2590_s6 = scalar_lea.vmem %s2589_s3, 256  ;;  %p2591_p9 = scmp.lt.s32.totalorder %s477_s16, %s2589_s3 }
  0xbe   : > { %p2586_p0 = pnand %p2584_p12, %p3415_p3  ;;  %p2592_p13 = scmp.lt.s32.totalorder %s2590_s6, %s2583_s1 }
  0xc0   : > { %p2587_p7 = pneg %p2586_p0  ;;  %p2593_p11 = por %p2592_p13, %p2591_p9 }
  0xc2   : > { %p2594_p1 = pnand %p2593_p11, %p2587_p7 }
  0xc4   : > { %2597 = shalt.err (!%p2594_p1)
}
  0xc5   : > { %p3416_p8 = scmp.ne.s32.totalorder %s3407_s26, 0  ;;  %s3088_s23 = scalar_lea.hbm %s3345_s2, %s2970_s11 }
  0xc6   : > { %s505_s27 = scalar_lea.vmem [#allocation7], %s2967_s10  ;;  %s2598_s12 = scalar_lea.hbm %s3088_s23, 128 }
  0xc7   : > { %2340 = dma.hbm_to_vmem [thread:$0]  (!%p3416_p8), %s3062_s17, 128, %s477_s16, %s466_s18  }
  0xc8   : > { %s512_s5 = sshll.u32 %s505_s27, 4  ;;  %p2599_p6 = scmp.ne.s32.totalorder %s3088_s23, %s2598_s12  ;;  %s513_s5 = int_to_ptr.vmem [resolvable:$true] %s512_s5 }
  0xc9   : > { %s2603_s17 = scalar_lea.hbm %s3345_s2, 256  ;;  %p2604_p2 = scmp.lt.u32.totalorder %s3088_s23, %s3345_s2 }
  0xca   : > { %p2601_p5 = pnand %p2599_p6, %p3415_p3  ;;  %p2605_p4 = scmp.lt.u32.totalorder %s2603_s17, %s2598_s12 }
  0xcb   : > { %p2607_p0 = scmp.lt.u32.totalorder %s2598_s12, %s3088_s23 }
  0xcc   : > { %p2602_p10 = pneg %p2601_p5  ;;  %p2606_p12 = por %p2605_p4, %p2604_p2 }
  0xce   : > { %p2608_p7 = por %p2607_p0, %p2606_p12 }
  0xd0   : > { %p2609_p9 = pnand %p2608_p7, %p2602_p10 }
  0xd2   : > { %2612 = shalt.err (!%p2609_p9)
}
  0xd3   : > { %s2613_s10 = scalar_lea.vmem %s513_s5, 128  ;;  %s2748_s11 = smov [#allocation7]  }
  0xd4   : > { %p2614_p13 = scmp.ne.s32.totalorder %s513_s5, %s2613_s10  ;;  %s2618_s28 = sshll.u32 %s2748_s11, 4  ;;  %s2619_s28 = int_to_ptr.vmem [resolvable:$false] %s2618_s28 }
  0xd5   : > { %s2620_s1 = scalar_lea.vmem %s2619_s28, 256  ;;  %p2621_p6 = scmp.lt.s32.totalorder %s513_s5, %s2619_s28 }
  0xd6   : > { %p2616_p11 = pnand %p2614_p13, %p3415_p3  ;;  %p2622_p5 = scmp.lt.s32.totalorder %s2620_s1, %s2613_s10 }
  0xd8   : > { %p2617_p1 = pneg %p2616_p11  ;;  %p2623_p8 = por %p2622_p5, %p2621_p6 }
  0xda   : > { %p2624_p2 = pnand %p2623_p8, %p2617_p1 }
  0xdc   : > { %2627 = shalt.err (!%p2624_p2)
}
  0xdd   : > { %p3417_p4 = scmp.ne.s32.totalorder %s3407_s26, 0  ;;  %p3418_p10 = scmp.ne.s32.totalorder %s3395_s20, 0 }
  0xde   : > { %s3112_s25 = sand.u32 (!%p3418_p10), 1, %s2730_s30   ;;  %p3419_p3 = scmp.ne.s32.totalorder (!%p3418_p10), %s3402_s21, 0 }
  0xdf   : > { %2346 = dma.hbm_to_vmem [thread:$0]  (!%p3417_p4), %s3088_s23, 128, %s513_s5, %s2988_s14  }
  0xe0   : > { %521 = sbr.rel (%p3418_p10) target bundleno = 3139 (0xc43), region = 72  ;;  %s3115_s24 = sshll.u32 (!%p3418_p10), %s3112_s25, 3 }
  0xe1   : > { %s524_s3 = scalar_lea.sflag (!%p3418_p10), [#allocation3], %s3112_s25  ;;  %s527_s6 = scalar_lea.vmem (!%p3418_p10), [#allocation2], %s3115_s24 }
  0xe7   : > { %2701 = dma.done.wait (%p3419_p3), %s524_s3, 128  }
  0xe8   : > { %2703 = vsyncadd (%p3419_p3), %s524_s3, 4294967168  ;;  %s532_s20 = sand.u32 1, %s2853_s19   ;;  %s536_s26 = scalar_lea.vmem [#allocation5], %s3115_s24 }
  0xe9   : > { %s533_s14 = scalar_lea.sflag [#allocation6], %s532_s20 }
  0xea   : > { %2705 = dma.done.wait (%p3419_p3), %s533_s14, 256  }
  0xeb   : > { %2707 = vsyncadd (%p3419_p3), %s533_s14, 4294967040  ;;  %s545_s9 = scalar_lea.vmem [#allocation7], %s3115_s24  ;;  %p3420_p8 = scmp.eq.s32.totalorder %s2853_s19, 0 }
  0xed   : > { %2709 = dma.done.wait (%p3420_p8), [#allocation9], 1024   ;;  %p3421_p12 = pmov %p3420_p8 }
  0xee   : > { %p3422_p0 = pmov %p3420_p8 }
  0xef   : > { %2711 = vsyncadd (%p3421_p12), [#allocation9], 4294966272 }
  0xf0   : > { %2713 = dma.done.wait (%p3422_p0), [#allocation12], 528   ;;  %p3423_p7 = pmov %p3422_p0 }
  0xf1   : > { %v2749_v0 = vmov 0.0|0.0   ;;  %vm2750_vm0 = vmmov 0   ;;  %v2751_v1 = vmov 0.0   ;;  %v709_v2 = vld [vmem:[#allocation10] sm:$0xff]  ;;  %v710_v3 = vld [vmem:[#allocation10 + $0x8] sm:$0xff]  ;;  %v711_v7 = vld [vmem:[#allocation10 + $0x10] sm:$0xff] }
  0xf2   : > { %2715 = vsyncadd (%p3423_p7), [#allocation12], 4294966768  ;;  %2286 = vmatprep.subr.bf16.mxu1 %v2749_v0  ;;  %2280 = vmatprep.subr.bf16.mxu0 %v2749_v0  ;;  %v624_v4 = vld [vmem:[#allocation8] sm:$0xff]  ;;  %v2287_v5 = vpack.c.bf16 %v710_v3, %v709_v2  ;;  %v625_v6 = vld [vmem:[#allocation8 + $0x8] sm:$0xff]  ;;  %vm635_vm1 = vcmask 261120   ;;  %s3424_s5 = sld [smem:[#allocation32_spill]] }
  0xf3   : > { %2206 = vmatprep.mubr.msk.f32.mxu1 %vm2750_vm0, %v2751_v1  ;;  %2195 = vmatprep.mubr.msk.f32.mxu0 %vm2750_vm0, %v2751_v1  ;;  %v712_v8 = vld [vmem:[#allocation10 + $0x18] sm:$0xff]  ;;  %v2281_v9 = vpack.c.bf16 %v625_v6, %v624_v4  ;;  %v626_v10 = vld [vmem:[#allocation8 + $0x10] sm:$0xff]  ;;  %v622_v14 = vld [vmem:[%s536_s26] sm:$0xff]  ;;  %vm882_vm2 = vcmask 64512   ;;  %s2752_s12 = smov 120   ;;  %s2753_s22 = smov 112  }
  0xf4   : > { %v627_v11 = vld [vmem:[#allocation8 + $0x18] sm:$0xff]  ;;  %2288 = vmatpush3.bf16.msra.mxu1 %v2287_v5  ;;  %v2290_v12 = vpack.c.bf16 %v712_v8, %v711_v7  ;;  %v793_v16 = vld [vmem:[#allocation11] sm:$0xff]  ;;  %v794_v17 = vld [vmem:[#allocation11 + $0x8] sm:$0xff]  ;;  %s2754_s29 = smov 104   ;;  %s3425_s18 = sld [smem:[#allocation33_spill]] }
  0xf5   : > { %2282 = vmatpush3.bf16.msra.mxu0 %v2281_v9  ;;  %2289 = vmatprep.subr.bf16.mxu1 %v2749_v0  ;;  %v2284_v13 = vpack.c.bf16 %v627_v11, %v626_v10  ;;  %v3146_v15 = vld [vmem:[%s527_s6] sm:$0xff]  ;;  %v2293_v19 = vpack.c.bf16 %v794_v17, %v793_v16  ;;  %v2121_v34 = vld [vmem:[#allocation13] ss:$0 sm:$0xff]  ;;  %s620_s20 = scalar_lea.vmem [#allocation15], %s3115_s24  ;;  %s3427_s21 = sld [smem:[#allocation27_spill]] }
  0xf6   : > { %2283 = vmatprep.subr.bf16.mxu0 %v2749_v0  ;;  %v795_v18 = vld [vmem:[#allocation11 + $0x10] sm:$0xff]  ;;  %v796_v20 = vld [vmem:[#allocation11 + $0x18] sm:$0xff]  ;;  %s2144_s13 = sshll.u32 %s2853_s19, 7  ;;  %s2755_s16 = smov [#allocation15]  }
  0xf7   : > { %v2296_v21 = vpack.c.bf16 %v796_v20, %v795_v18  ;;  %v623_v22 = vld [vmem:[%s545_s9] sm:$0xff]  ;;  %s3426_s9 = sld [smem:[#allocation34_spill]]  ;;  %s2632_s10 = sshll.u32 %s2755_s16, 4  ;;  %s2633_s10 = int_to_ptr.vmem [resolvable:$false] %s2632_s10 }
  0xf8   : > { %2291 = vmatpush3.bf16.msra.mxu1 %v2290_v12  ;;  %v2119_v23 = vld [vmem:[%s3350_s7] ss:$0 sm:$0xff]  ;;  %s2634_s11 = scalar_lea.vmem %s2633_s10, 256 }
  0xf9   : > { %2285 = vmatpush3.bf16.msra.mxu0 %v2284_v13  ;;  %2220 = vmatprep.subr.mxu1 %v2751_v1  ;;  %v2117_v24 = vld [vmem:[%s3424_s5] ss:$0 sm:$0xff]  ;;  %s3428_s5 = sld [smem:[#allocation38_spill]] }
  0xfa   : > { %2292 = vmatprep.subr.bf16.mxu0 %v2749_v0  ;;  %v879_v57 = vld [vmem:[%s3425_s18 + $0x8] sm:$0xff]  ;;  %v878_v62 = vld [vmem:[%s3425_s18] sm:$0xff] }
  0xfb   : > { %2207 = vmatmul.mubr.msk.f32.vlgmr.msra.gmra.mrb[0].mxu1 %vm635_vm1, %v622_v14  ;;  %p3429_p13 = scmp.ne.s32.totalorder %s3427_s21, 0 }
  0xfc   : > { %2196 = vmatmul.mubr.msk.f32.vlgmr.msra.gmra.mrb[0].mxu0 %vm635_vm1, %v3146_v15  ;;  %2222 = vmatprep.mubr.msk.f32.mxu1 %vm2750_vm0, %v2751_v1 }
  0xfd   : > { %2217 = vmatprep.mubr.msk.f32.mxu0 %vm2750_vm0, %v2751_v1  ;;  %2294 = vmatpush3.bf16.msra.mxu0 %v2293_v19 }
  0xfe   : > { %2295 = vmatprep.subr.bf16.mxu0 %v2749_v0 }
 0x101   : > { %2297 = vmatpush3.bf16.msra.mxu0 %v2296_v21 }
 0x102   : > { %2230 = vmatprep.subr.mxu0 %v2751_v1 }
 0x104   : > { %2218 = vmatmul.mubr.msk.f32.vlgmr.msra.gmra.mrb[2].mxu0 %vm635_vm1, %v623_v22 }
 0x105   : > { %2232 = vmatprep.mubr.msk.f32.mxu0 %vm2750_vm0, %v2751_v1 }
 0x1ce   : > { %v789_v25 = vpop.f32.mrb[0].mxu1 }
 0x1cf   : > { %v790_v26 = vadd.f32 %v2119_v23, %v789_v25  ;;  %v705_v27 = vpop.f32.mrb[0].mxu0  ;;  %v2208_v28 = vpop.f32.mrb[1].mxu1 }
 0x1d0   : > { %v706_v29 = vadd.f32 %v2117_v24, %v705_v27  ;;  %v2197_v30 = vpop.f32.mrb[1].mxu0  ;;  %v880_v28 = vld [vmem:[%s3425_s18 + $0x10] sm:$0xff] }
 0x1d1   : > { %1046 = vrot.lane.b32.xlu0 %v790_v26, %s2752_s12  ;;  %2221 = vmatpush3.xpose.msk.msra.mxu1 %vm882_vm2, %v790_v26 }
 0x1d2   : > { %v3170_v31 = vmul.f32 0.35355338, %v706_v29  ;;  %2225 = vmatprep.subr.mxu1 %v2751_v1 }
 0x1d4   : > { %2223 = vmatmul.mubr.msk.f32.vlgmr.msra.gmra.mrb[2].mxu1 %vm882_vm2, %v3170_v31 }
 0x1d5   : > { %1044 = vrot.lane.b32.xlu0 %v3170_v31, %s2752_s12  ;;  %2227 = vmatprep.mubr.msk.f32.mxu1 %vm2750_vm0, %v2751_v1 }
 0x1d7   : > { %v873_v35 = vpop.f32.mrb[2].mxu0 }
 0x1d8   : > { %v3184_v36 = vadd.f32 %v2121_v34, %v873_v35  ;;  %v2219_v37 = vpop.f32.mrb[3].mxu0 }
 0x1da   : > { %2226 = vmatpush3.msra.mxu1 %v3184_v36 }
 0x1db   : > { %2235 = vmatprep.subr.mxu1 %v2751_v1 }
 0x243   : > { %v1047_v32 = vpop.permute.xlu0 %1046 }
 0x244   : > { %2231 = vmatpush3.xpose.msk.msra.mxu0 %vm882_vm2, %v1047_v32 }
 0x245   : > { %2240 = vmatprep.subr.mxu0 %v2751_v1 }
 0x247   : > { %v1045_v33 = vpop.permute.xlu0 %1044 }
 0x248   : > { %2233 = vmatmul.mubr.msk.f32.vlgmr.msra.gmra.mrb[4].mxu0 %vm882_vm2, %v1045_v33 }
 0x249   : > { %2242 = vmatprep.mubr.msk.f32.mxu0 %vm2750_vm0, %v2751_v1  ;;  %2241 = vmatpush3.msra.mxu0 %v879_v57 }
 0x24a   : > { %2250 = vmatprep.subr.mxu0 %v2751_v1 }
 0x2a7   : > { %v955_v38 = vpop.f32.mrb[2].mxu1 }
 0x2a8   : > { %v2224_v39 = vpop.f32.mrb[3].mxu1  ;;  %v959_v40 = vsel %vm882_vm2, %v955_v38, -inf }
 0x2a9   : > { %960 = vmax.xlane.f32.xlu1 %v959_v40 }
 0x31b   : > { %v1118_v41 = vpop.f32.mrb[4].mxu0 }
 0x31c   : > { %v2234_v42 = vpop.f32.mrb[5].mxu0  ;;  %v1122_v43 = vsel %vm882_vm2, %v1118_v41, -inf }
 0x31d   : > { %1123 = vmax.xlane.f32.xlu1 %v1122_v43 }
 0x336   : > { %v961_v44 = vpop.xlane.xlu1 %960 }
 0x337   : > { %v962_v45 = vsub.f32 %v955_v38, %v961_v44 }
 0x339   : > { %v963_v46 = vmul.f32 1.442695, %v962_v45 }
 0x33b   : > { %2408 = vpow2.f32 %v963_v46 }
 0x345   : > { %v2409_v47 = vpop.eup %2408 }
 0x346   : > { %v965_v48 = vsel %vm882_vm2, %v2409_v47, 0.0 }
 0x347   : > { %966 = vadd.xlane.f32.xlu0 %v965_v48 }
 0x35d   : > { %1447 = vrot.lane.b32.xlu0 %v3184_v36, %s2753_s22 }
 0x361   : > { %1599 = vrot.lane.b32.xlu0 %v790_v26, %s2754_s29 }
 0x3aa   : > { %v1124_v49 = vpop.xlane.xlu1 %1123 }
 0x3ab   : > { %v1125_v50 = vsub.f32 %v1118_v41, %v1124_v49 }
 0x3ad   : > { %v1126_v51 = vmul.f32 1.442695, %v1125_v50 }
 0x3af   : > { %2410 = vpow2.f32 %v1126_v51  ;;  %v2139_v51 = vld [vmem:[%s3426_s9] ss:$0 sm:$0xff] }
 0x3b9   : > { %v2411_v52 = vpop.eup %2410 }
 0x3ba   : > { %v1128_v53 = vsel %vm882_vm2, %v2411_v52, 0.0 }
 0x3bb   : > { %1129 = vadd.xlane.f32.xlu1 %v1128_v53 }
 0x3cc   : > { %1135 = vrot.lane.b32.xlu1 %v3184_v36, %s2752_s12  ;;  %s3266_s12 = scalar_lea.hbm %s3428_s5, %s2144_s13 }
 0x3d0   : > { %1359 = vrot.lane.b32.xlu1 %v790_v26, %s2753_s22 }
 0x3d4   : > { %v967_v54 = vpop.xlane.xlu0 %966  ;;  %1357 = vrot.lane.b32.xlu1 %v3170_v31, %s2753_s22  ;;  %s1911_s22 = sshll.u32 %s620_s20, 4  ;;  %s1912_s22 = int_to_ptr.vmem [resolvable:$true] %s1911_s22 }
 0x3d5   : > { %2412 = vrcp.f32 %v967_v54  ;;  %s2628_s17 = scalar_lea.vmem %s1912_s22, 128  ;;  %p2635_p6 = scmp.lt.s32.totalorder %s1912_s22, %s2633_s10 }
 0x3d6   : > { %p2629_p9 = scmp.ne.s32.totalorder %s1912_s22, %s2628_s17  ;;  %p2636_p5 = scmp.lt.s32.totalorder %s2634_s11, %s2628_s17 }
 0x3d8   : > { %v1448_v0 = vpop.permute.xlu0 %1447  ;;  %p2630_p11 = pnand %p2629_p9, %p3429_p13  ;;  %p2637_p2 = por %p2636_p5, %p2635_p6 }
 0x3da   : > { %p2631_p1 = pneg %p2630_p11 }
 0x3dc   : > { %v1600_v21 = vpop.permute.xlu0 %1599  ;;  %p2638_p4 = pnand %p2637_p2, %p2631_p1 }
 0x3df   : > { %v2413_v55 = vpop.eup %2412 }
 0x3e0   : > { %v969_v56 = vmul.f32 %v2413_v55, %v2409_v47 }
 0x3e2   : > { %2228 = vmatmul.mubr.msk.f32.vlgmr.msra.gmra.mrb[4].mxu1 %vm882_vm2, %v969_v56 }
 0x3e3   : > { %2237 = vmatprep.mubr.msk.f32.mxu1 %vm2750_vm0, %v2751_v1 }
 0x448   : > { %v1130_v58 = vpop.xlane.xlu1 %1129 }
 0x449   : > { %2414 = vrcp.f32 %v1130_v58 }
 0x44c   : > { %v1136_v59 = vpop.permute.xlu1 %1135 }
 0x44d   : > { %2236 = vmatpush3.msra.mxu1 %v1136_v59 }
 0x44e   : > { %2245 = vmatprep.subr.mxu1 %v2751_v1 }
 0x450   : > { %v1360_v3 = vpop.permute.xlu1 %1359 }
 0x453   : > { %v2415_v60 = vpop.eup %2414 }
 0x454   : > { %v1132_v61 = vmul.f32 %v2415_v60, %v2411_v52  ;;  %v1358_v6 = vpop.permute.xlu1 %1357 }
 0x456   : > { %2238 = vmatmul.mubr.msk.f32.vlgmr.msra.gmra.mrb[6].mxu1 %vm882_vm2, %v1132_v61  ;;  %v1133_v24 = vadd.f32 %v1132_v61, %v969_v56 }
 0x457   : > { %2246 = vmatpush3.msra.mxu1 %v878_v62  ;;  %2247 = vmatprep.mubr.msk.f32.mxu1 %vm2750_vm0, %v2751_v1 }
 0x458   : > { %2255 = vmatprep.subr.mxu1 %v2751_v1 }
 0x4b5   : > { %v1040_v63 = vpop.f32.mrb[4].mxu1 }
 0x4b6   : > { %v2229_v2 = vpop.f32.mrb[5].mxu1  ;;  %2248 = vmatmul.mubr.msk.f32.vlgmr.msra.gmra.mrb[8].mxu1 %vm882_vm2, %v1040_v63 }
 0x4b7   : > { %2256 = vmatpush3.msra.mxu1 %v1448_v0  ;;  %2257 = vmatprep.mubr.msk.f32.mxu1 %vm2750_vm0, %v2751_v1 }
 0x4b8   : > { %2265 = vmatprep.subr.mxu1 %v2751_v1 }
 0x529   : > { %v1207_v4 = vpop.f32.mrb[6].mxu1 }
 0x52a   : > { %v2239_v5 = vpop.f32.mrb[7].mxu1  ;;  %2243 = vmatmul.mubr.msk.f32.vlgmr.msra.gmra.mrb[6].mxu0 %vm882_vm2, %v1207_v4 }
 0x52b   : > { %2251 = vmatpush3.xpose.msk.msra.mxu0 %vm882_vm2, %v1360_v3  ;;  %2252 = vmatprep.mubr.msk.f32.mxu0 %vm2750_vm0, %v2751_v1 }
 0x52c   : > { %2260 = vmatprep.subr.mxu0 %v2751_v1 }
 0x52e   : > { %2253 = vmatmul.mubr.msk.f32.vlgmr.msra.gmra.mrb[8].mxu0 %vm882_vm2, %v1358_v6 }
 0x52f   : > { %2262 = vmatprep.mubr.msk.f32.mxu0 %vm2750_vm0, %v2751_v1  ;;  %2261 = vmatpush3.msra.mxu0 %v880_v28 }
 0x530   : > { %2270 = vmatprep.subr.mxu0 %v2751_v1 }
 0x589   : > { %v1353_v7 = vpop.f32.mrb[8].mxu1 }
 0x58a   : > { %v2249_v8 = vpop.f32.mrb[9].mxu1 }
 0x5fd   : > { %v1280_v9 = vpop.f32.mrb[6].mxu0 }
 0x5fe   : > { %v1354_v10 = vadd.f32 %v1353_v7, %v1280_v9  ;;  %v2244_v11 = vpop.f32.mrb[7].mxu0 }
 0x601   : > { %v1431_v12 = vpop.f32.mrb[8].mxu0 }
 0x602   : > { %v2254_v13 = vpop.f32.mrb[9].mxu0  ;;  %v1435_v14 = vsel %vm882_vm2, %v1431_v12, -inf }
 0x603   : > { %1436 = vmax.xlane.f32.xlu1 %v1435_v14 }
 0x690   : > { %v1437_v16 = vpop.xlane.xlu1 %1436 }
 0x691   : > { %v1438_v17 = vsub.f32 %v1431_v12, %v1437_v16 }
 0x693   : > { %v1439_v18 = vmul.f32 1.442695, %v1438_v17 }
 0x695   : > { %2416 = vpow2.f32 %v1439_v18 }
 0x69f   : > { %v2417_v19 = vpop.eup %2416 }
 0x6a0   : > { %v1441_v20 = vsel %vm882_vm2, %v2417_v19, 0.0 }
 0x6a1   : > { %1442 = vadd.xlane.f32.xlu0 %v1441_v20 }
 0x6b7   : > { %1597 = vrot.lane.b32.xlu0 %v3170_v31, %s2754_s29 }
 0x72e   : > { %v1443_v22 = vpop.xlane.xlu0 %1442 }
 0x72f   : > { %2418 = vrcp.f32 %v1443_v22 }
 0x732   : > { %v1598_v27 = vpop.permute.xlu0 %1597 }
 0x739   : > { %v2419_v23 = vpop.eup %2418 }
 0x73a   : > { %v1445_v25 = vmul.f32 %v2419_v23, %v2417_v19 }
 0x73c   : > { %v1446_v26 = vadd.f32 %v1445_v25, %v1133_v24  ;;  %2258 = vmatmul.mubr.msk.f32.vlgmr.msra.gmra.mrb[10].mxu1 %vm882_vm2, %v1445_v25 }
 0x73d   : > { %2266 = vmatpush3.xpose.msk.msra.mxu1 %vm882_vm2, %v1600_v21  ;;  %2267 = vmatprep.mubr.msk.f32.mxu1 %vm2750_vm0, %v2751_v1 }
 0x73e   : > { %2275 = vmatprep.subr.mxu1 %v2751_v1 }
 0x740   : > { %2268 = vmatmul.mubr.msk.f32.vlgmr.msra.gmra.mrb[12].mxu1 %vm882_vm2, %v1598_v27 }
 0x741   : > { %2277 = vmatprep.mubr.msk.f32.mxu1 %vm2750_vm0, %v2751_v1 }
 0x80f   : > { %v1519_v29 = vpop.f32.mrb[10].mxu1 }
 0x810   : > { %v2259_v30 = vpop.f32.mrb[11].mxu1  ;;  %2263 = vmatmul.mubr.msk.f32.vlgmr.msra.gmra.mrb[10].mxu0 %vm882_vm2, %v1519_v29 }
 0x811   : > { %2272 = vmatprep.mubr.msk.f32.mxu0 %vm2750_vm0, %v2751_v1  ;;  %v881_v1 = vld [vmem:[%s3425_s18 + $0x18] sm:$0xff] }
 0x812   : > { %2276 = vmatpush3.msra.mxu1 %v881_v1 }
 0x813   : > { %v1671_v31 = vpop.f32.mrb[12].mxu1 }
 0x814   : > { %v2269_v32 = vpop.f32.mrb[13].mxu1  ;;  %v1675_v33 = vsel %vm882_vm2, %v1671_v31, -inf }
 0x815   : > { %1676 = vmax.xlane.f32.xlu0 %v1675_v33 }
 0x8a2   : > { %v1677_v34 = vpop.xlane.xlu0 %1676 }
 0x8a3   : > { %v1678_v35 = vsub.f32 %v1671_v31, %v1677_v34 }
 0x8a5   : > { %v1679_v37 = vmul.f32 1.442695, %v1678_v35 }
 0x8a7   : > { %2420 = vpow2.f32 %v1679_v37 }
 0x8b1   : > { %v2421_v38 = vpop.eup %2420 }
 0x8b2   : > { %v1681_v39 = vsel %vm882_vm2, %v2421_v38, 0.0 }
 0x8b3   : > { %1682 = vadd.xlane.f32.xlu1 %v1681_v39 }
 0x8c4   : > { %1687 = vrot.lane.b32.xlu1 %v3184_v36, %s2754_s29  ;;  %s1885_s29 = scalar_lea.sflag [#allocation16], %s3112_s25 }
 0x8e3   : > { %v1592_v40 = vpop.f32.mrb[10].mxu0 }
 0x8e4   : > { %v1596_v41 = vadd.f32 %v1592_v40, %v1354_v10  ;;  %v2264_v42 = vpop.f32.mrb[11].mxu0 }
 0x940   : > { %v1683_v43 = vpop.xlane.xlu1 %1682 }
 0x941   : > { %2422 = vrcp.f32 %v1683_v43 }
 0x944   : > { %v1688_v44 = vpop.permute.xlu1 %1687 }
 0x945   : > { %2271 = vmatpush3.msra.mxu0 %v1688_v44 }
 0x94b   : > { %v2423_v45 = vpop.eup %2422 }
 0x94c   : > { %v1685_v46 = vmul.f32 %v2423_v45, %v2421_v38 }
 0x94e   : > { %v1686_v47 = vadd.f32 %v1685_v46, %v1446_v26  ;;  %2273 = vmatmul.mubr.msk.f32.vlgmr.msra.gmra.mrb[12].mxu0 %vm882_vm2, %v1685_v46 }
 0x950   : > { %v1877_v48 = vmul.f32 0.25, %v1686_v47 }
 0x952   : > { %1878 = vst.msk [vmem:[%s620_s20] sm:$0xff] %vm882_vm2, %v1877_v48 }
 0xa21   : > { %v1759_v36 = vpop.f32.mrb[12].mxu0 }
 0xa22   : > { %v2274_v49 = vpop.f32.mrb[13].mxu0  ;;  %2278 = vmatmul.mubr.msk.f32.vlgmr.msra.gmra.mrb[14].mxu1 %vm882_vm2, %v1759_v36 }
 0xaf5   : > { %v1832_v50 = vpop.f32.mrb[14].mxu1 }
 0xaf6   : > { %v1836_v52 = vadd.f32 %v1832_v50, %v1596_v41  ;;  %v2279_v53 = vpop.f32.mrb[15].mxu1 }
 0xaf8   : > { %v1844_v54 = vadd.f32 %v2139_v51, %v1836_v52 }
 0xafa   : > { %v1845_v55 = vadd.f32 %v1844_v54, %v3146_v15 }
 0xafc   : > { %v1846_v56 = vsel %vm635_vm1, %v1845_v55, 0.0 }
 0xafd   : > { %1847 = vadd.xlane.f32.xlu1 %v1846_v56 }
 0xb8a   : > { %v1848_v57 = vpop.xlane.xlu1 %1847 }
 0xb8b   : > { %v1850_v58 = vmul.f32 0.03125, %v1848_v57 }
 0xb8d   : > { %v1851_v59 = vsub.f32 %v1845_v55, %v1850_v58 }
 0xb8f   : > { %v1852_v60 = vmul.f32 %v1851_v59, %v1851_v59 }
 0xb91   : > { %v1853_v61 = vsel %vm635_vm1, %v1852_v60, 0.0 }
 0xb92   : > { %1854 = vadd.xlane.f32.xlu0 %v1853_v61 }
 0xb93   : > { %2641 = shalt.err (!%p2638_p4)
}
 0xb94   : > { %s2642_s28 = scalar_lea.hbm %s3266_s12, 128  ;;  %s2646_s6 = scalar_lea.hbm %s3428_s5, 256 }
 0xb95   : > { %p2643_p10 = scmp.ne.s32.totalorder %s3266_s12, %s2642_s28  ;;  %p2647_p12 = scmp.lt.u32.totalorder %s3266_s12, %s3428_s5 }
 0xb96   : > { %p2648_p0 = scmp.lt.u32.totalorder %s2646_s6, %s2642_s28  ;;  %p2650_p9 = scmp.lt.u32.totalorder %s2642_s28, %s3266_s12 }
 0xb97   : > { %p2644_p3 = pnand %p2643_p10, %p3429_p13 }
 0xb98   : > { %p2649_p7 = por %p2648_p0, %p2647_p12 }
 0xb99   : > { %p2645_p8 = pneg %p2644_p3 }
 0xb9a   : > { %p2651_p11 = por %p2650_p9, %p2649_p7 }
 0xb9c   : > { %p2652_p1 = pnand %p2651_p11, %p2645_p8 }
 0xb9e   : > { %2655 = shalt.err (!%p2652_p1)
}
 0xb9f   : > { %2321 = dma.vmem_to_hbm [thread:$0]  (%p3429_p13), %s1912_s22, 128, %s3266_s12, %s1885_s29  }
 0xba0   : > { %s3430_s23 = sld [smem:[#allocation35_spill]]  ;;  %s3431_s16 = sld [smem:[#allocation36_spill]] }
 0xba1   : > { %s613_s10 = scalar_lea.vmem [#allocation14], %s3115_s24  ;;  %s3432_s29 = sld [smem:[#allocation37_spill]] }
 0xba2   : > { %s1898_s11 = sshll.u32 %s613_s10, 4  ;;  %s1880_s3 = scalar_lea.sflag [#allocation4], %s3112_s25  ;;  %s3300_s11 = int_to_ptr.vmem [resolvable:$true] %s1898_s11 }
 0xba3   : > { %s2656_s6 = scalar_lea.vmem %s3300_s11, 128  ;;  %s2756_s24 = smov [#allocation14]  }
 0xba4   : > { %p2657_p6 = scmp.ne.s32.totalorder %s3300_s11, %s2656_s6  ;;  %s2660_s19 = sshll.u32 %s2756_s24, 4  ;;  %s2661_s19 = int_to_ptr.vmem [resolvable:$false] %s2660_s19 }
 0xba5   : > { %s2662_s20 = scalar_lea.vmem %s2661_s19, 256  ;;  %p2663_p4 = scmp.lt.s32.totalorder %s3300_s11, %s2661_s19 }
 0xba6   : > { %v2140_v2 = vld [vmem:[%s3430_s23] ss:$0 sm:$0xff]  ;;  %p2658_p5 = pnand %p2657_p6, %p3429_p13  ;;  %p2664_p10 = scmp.lt.s32.totalorder %s2662_s20, %s2656_s6 }
 0xba7   : > { %v2141_v4 = vld [vmem:[%s3431_s16] ss:$0 sm:$0xff]  ;;  %s3433_s28 = smov %s3432_s29  ;;  %s3298_s1 = scalar_lea.hbm %s3432_s29, %s2144_s13 }
 0xba8   : > { %p2659_p2 = pneg %p2658_p5  ;;  %p2665_p3 = por %p2664_p10, %p2663_p4 }
 0xbaa   : > { %p2666_p8 = pnand %p2665_p3, %p2659_p2 }
 0xc1f   : > { %v1855_v15 = vpop.xlane.xlu0 %1854 }
 0xc20   : > { %v1856_v62 = vmul.f32 0.03125, %v1855_v15 }
 0xc22   : > { %v1857_v63 = vadd.f32 1e-05, %v1856_v62 }
 0xc24   : > { %2424 = vrsqrt.f32 %v1857_v63 }
 0xc2e   : > { %v2425_v0 = vpop.eup %2424 }
 0xc2f   : > { %v1859_v3 = vmul.f32 %v2425_v0, %v1851_v59 }
 0xc31   : > { %v1867_v5 = vmul.f32 %v2140_v2, %v1859_v3 }
 0xc33   : > { %v1875_v6 = vadd.f32 %v2141_v4, %v1867_v5 }
 0xc35   : > { %1876 = vst.msk [vmem:[%s613_s10] sm:$0xff] %vm635_vm1, %v1875_v6 }
 0xc36   : > { %2669 = shalt.err (!%p2666_p8)
}
 0xc37   : > { %s2670_s25 = scalar_lea.hbm %s3298_s1, 128  ;;  %s2674_s26 = scalar_lea.hbm %s3433_s28, 256 }
 0xc38   : > { %p2671_p12 = scmp.ne.s32.totalorder %s3298_s1, %s2670_s25  ;;  %p2675_p9 = scmp.lt.u32.totalorder %s3298_s1, %s3433_s28 }
 0xc39   : > { %p2676_p11 = scmp.lt.u32.totalorder %s2674_s26, %s2670_s25  ;;  %p2678_p6 = scmp.lt.u32.totalorder %s2670_s25, %s3298_s1 }
 0xc3a   : > { %p2672_p0 = pnand %p2671_p12, %p3429_p13 }
 0xc3b   : > { %p2677_p1 = por %p2676_p11, %p2675_p9 }
 0xc3c   : > { %p2673_p7 = pneg %p2672_p0 }
 0xc3d   : > { %p2679_p5 = por %p2678_p6, %p2677_p1 }
 0xc3f   : > { %p2680_p2 = pnand %p2679_p5, %p2673_p7 }
 0xc41   : > { %2683 = shalt.err (!%p2680_p2)
}
 0xc42   : > { %2320 = dma.vmem_to_hbm [thread:$0]  (%p3429_p13), %s3300_s11, 128, %s3298_s1, %s1880_s3  }
 0xc43 PF: > { %s3434_s27 = sld [smem:[#allocation23_spill]]  ;;  %s3435_s17 = sld [smem:[#allocation28_spill]] }
 0xc44   : > { %s3436_s16 = sld [smem:[#allocation24_spill]] }
 0xc49   : > { %s1923_s10 = sand.u32 1, %s3434_s27   ;;  %p3437_p4 = scmp.ne.s32.totalorder %s3435_s17, 0 }
 0xc4a   : > { %p3438_p10 = scmp.ge.s32.totalorder %s3436_s16, 2  ;;  %s1924_s12 = scalar_lea.sflag [#allocation4], %s1923_s10 }
 0xc4c   : > { %p2348_p3 = pnand %p3438_p10, %p3437_p4 }
 0xc4e   : > { %2717 = dma.done.wait (!%p2348_p3), %s1924_s12, 128  }
 0xc4f   : > { %2719 = vsyncadd (!%p2348_p3), %s1924_s12, 4294967168  ;;  %s1933_s22 = scalar_lea.sflag [#allocation16], %s1923_s10 }
 0xc50   : > { %2721 = dma.done.wait (!%p2348_p3), %s1933_s22, 128  }
 0xc51   : > { %2723 = vsyncadd (!%p2348_p3), %s1933_s22, 4294967168  ;;  %s3439_s16 = sld [smem:[#allocation25_spill]]  ;;  %s3440_s21 = sld [smem:[#allocation26_spill]] }
 0xc52   : > { %s3441_s29 = smov %s2730_s30  ;;  %s3442_s30 = smov %s2734_s15 }
 0xc57   : > { %p36_p13 = scmp.ge.s32.totalorder %s3439_s16, 4   ;;  %s3443_s15 = smov %s3440_s21 }
 0xc59   :  { %38 = sbr.rel (!%p36_p13) target bundleno = 22 (0x16), region = 174 }
 0xc60   :  { %1938 = vsyncpa [#allocation3], 1 }
 0xc61   :  { %1940 = vsyncpa [#allocation3 + $0x1], 1 }
 0xc62   :  { %1941 = vsyncpa [#allocation6], 1 }
 0xc63   :  { %1943 = vsyncpa [#allocation6 + $0x1], 1 }
 0xc64   :  { %1944 = vsyncpa [#allocation9], 1 }
 0xc65   :  { %1945 = vsyncpa [#allocation12], 1 }
 0xc66   :  { %1946 = vsyncpa [#allocation4], 1 }
 0xc67   :  { %1948 = vsyncpa [#allocation4 + $0x1], 1 }
 0xc68   :  { %1949 = vsyncpa [#allocation16], 1 }
 0xc69   :  { %1951 = vsyncpa [#allocation16 + $0x1], 1 }

</bundles_post_ra>
